<compile_context>
chip_gen: v7x
topology: tpu7x:2x2x1
jax: 0.10.0
libtpu: 0.0.40
codegen_flags: <defaults>
</compile_context>

<pallas_src>
import functools

import jax
import jax.numpy as jnp
from jax.experimental import pallas as pl
from jax.experimental.pallas import tpu as pltpu


LANE_PAD = 128  # halo padding (lanes) on each side of the flattened H*W axis


# ----------------------------------------------------------------------------
# Fused kernel
# ----------------------------------------------------------------------------
def basic_block_kernel(H, W,
                       x_ref, w1_ref, s1_ref, b1_ref, w2_ref, s2_ref, b2_ref,
                       o_ref, buf_ref):
    """One batch element: conv3x3+BN+ReLU -> conv3x3+BN -> +identity -> ReLU.

    x_ref   : (1, C, H*W)            f32   NCHW-flattened activations
    w*_ref  : (C, 9*C)               bf16  im2col-packed 3x3 weights
                                           (tap-major, cin-minor)
    s*/b*   : (C, 1)                 f32   folded BatchNorm scale / shift
    o_ref   : (1, C, H*W)            f32
    buf_ref : (C, H*W + 2*LANE_PAD)  f32   VMEM halo / staging buffer
    """
    HW = H * W
    C = x_ref.shape[1]

    x = x_ref[0]                                    # (C, HW) f32

    # Column-boundary masks, shared by both convs (row boundaries are handled
    # by the zero padding of the flat buffer).
    w_idx = jax.lax.broadcasted_iota(jnp.int32, (C, HW), 1) % W
    col_ok = (w_idx >= 1, None, w_idx < (W - 1))    # for dx = 0, 1, 2

    def conv3x3(src, w_ref):
        # Stage `src` into the zero-padded flat buffer; the +/-128-lane pads
        # absorb the +/-W row shifts of the 3x3 taps.
        buf_ref[:, :LANE_PAD] = jnp.zeros((C, LANE_PAD), jnp.float32)
        buf_ref[:, LANE_PAD + HW:] = jnp.zeros((C, LANE_PAD), jnp.float32)
        buf_ref[:, LANE_PAD:LANE_PAD + HW] = src

        taps = []
        for dy in range(3):
            for dx in range(3):
                off = (dy - 1) * W + (dx - 1)
                # static offset load straight from the ref (offset vld)
                t = buf_ref[:, LANE_PAD + off:LANE_PAD + off + HW]
                if col_ok[dx] is not None:
                    t = jnp.where(col_ok[dx], t, 0.0)
                taps.append(t)
        patch = jnp.concatenate(taps, axis=0).astype(jnp.bfloat16)  # (9C, HW)
        # Single MXU matmul: bf16 operands, f32 accumulation.
        return jnp.dot(w_ref[...], patch, preferred_element_type=jnp.float32)

    # conv1 -> BN1 -> ReLU   (stays in VMEM/vregs; never written to HBM)
    y1 = conv3x3(x, w1_ref)
    y1 = jnp.maximum(y1 * s1_ref[...] + b1_ref[...], 0.0)

    # conv2 -> BN2 -> +identity -> ReLU
    y2 = conv3x3(y1, w2_ref)
    y2 = y2 * s2_ref[...] + b2_ref[...] + x
    o_ref[0] = jnp.maximum(y2, 0.0)


# ----------------------------------------------------------------------------
# Wrappers
# ----------------------------------------------------------------------------
def fold_bn(gamma, beta, running_mean, running_var, eps=1e-5):
    scale = gamma / jnp.sqrt(running_var + eps)
    shift = beta - running_mean * scale
    return scale, shift


def _pack_conv_weight(w_hwio):
    """(3, 3, Cin, Cout) HWIO -> (Cout, 9*Cin) bf16, tap-major / cin-minor."""
    kh, kw, cin, cout = w_hwio.shape
    w = jnp.transpose(w_hwio, (3, 0, 1, 2)).reshape(cout, kh * kw * cin)
    return w.astype(jnp.bfloat16)


@jax.jit
def basic_block_forward(x_nchw, params):
    """BasicBlock forward (inplanes == planes, stride=1, downsample=None)."""
    N, C, H, W = x_nchw.shape
    HW = H * W
    x_flat = x_nchw.reshape(N, C, HW)   # contiguous reshape, no transpose

    s1, b1 = fold_bn(params["bn1_gamma"], params["bn1_beta"],
                     params["bn1_mean"], params["bn1_var"])
    s2, b2 = fold_bn(params["bn2_gamma"], params["bn2_beta"],
                     params["bn2_mean"], params["bn2_var"])
    w1 = _pack_conv_weight(params["w1"])
    w2 = _pack_conv_weight(params["w2"])

    img_spec = pl.BlockSpec((1, C, HW), lambda n: (n, 0, 0))
    w_spec = pl.BlockSpec((C, 9 * C), lambda n: (0, 0))
    vec_spec = pl.BlockSpec((C, 1), lambda n: (0, 0))

    out_flat = pl.pallas_call(
        functools.partial(basic_block_kernel, H, W),
        out_shape=jax.ShapeDtypeStruct((N, C, HW), jnp.float32),
        grid_spec=pltpu.PrefetchScalarGridSpec(
            num_scalar_prefetch=0,
            grid=(N,),
            in_specs=[img_spec, w_spec, vec_spec, vec_spec,
                      w_spec, vec_spec, vec_spec],
            out_specs=img_spec,
            scratch_shapes=[pltpu.VMEM((C, HW + 2 * LANE_PAD), jnp.float32)],
        ),
        compiler_params=pltpu.CompilerParams(
            dimension_semantics=("parallel",)),
    )(x_flat, w1, s1.reshape(C, 1), b1.reshape(C, 1),
      w2, s2.reshape(C, 1), b2.reshape(C, 1))

    return out_flat.reshape(N, C, H, W)


# ----------------------------------------------------------------------------
# Pure-JAX reference (full-f32 module semantics, for correctness check)
# ----------------------------------------------------------------------------
def reference_forward(x_nchw, params):
    def conv(x, w_hwio):
        return jax.lax.conv_general_dilated(
            x, w_hwio, window_strides=(1, 1), padding="SAME",
            dimension_numbers=("NCHW", "HWIO", "NCHW"))

    s1, b1 = fold_bn(params["bn1_gamma"], params["bn1_beta"],
                     params["bn1_mean"], params["bn1_var"])
    s2, b2 = fold_bn(params["bn2_gamma"], params["bn2_beta"],
                     params["bn2_mean"], params["bn2_var"])
    out = conv(x_nchw, params["w1"])
    out = out * s1[None, :, None, None] + b1[None, :, None, None]
    out = jnp.maximum(out, 0.0)
    out = conv(out, params["w2"])
    out = out * s2[None, :, None, None] + b2[None, :, None, None]
    out = out + x_nchw
    return jnp.maximum(out, 0.0)


# ----------------------------------------------------------------------------
if __name__ == "__main__":
    N, C, H, W = 2, 4, 16, 16   # inplanes = planes = 4, stride = 1
    key = jax.random.PRNGKey(0)
    keys = jax.random.split(key, 8)

    x = jax.random.normal(keys[0], (N, C, H, W), jnp.float32)

    params = dict(
        # conv weights stored as (kh, kw, Cin, Cout)  (HWIO)
        w1=0.1 * jax.random.normal(keys[1], (3, 3, C, C), jnp.float32),
        w2=0.1 * jax.random.normal(keys[2], (3, 3, C, C), jnp.float32),
        bn1_gamma=1.0 + 0.1 * jax.random.normal(keys[3], (C,), jnp.float32),
        bn1_beta=0.1 * jax.random.normal(keys[4], (C,), jnp.float32),
        bn1_mean=jnp.zeros((C,), jnp.float32),
        bn1_var=jnp.ones((C,), jnp.float32),
        bn2_gamma=1.0 + 0.1 * jax.random.normal(keys[5], (C,), jnp.float32),
        bn2_beta=0.1 * jax.random.normal(keys[6], (C,), jnp.float32),
        bn2_mean=jnp.zeros((C,), jnp.float32),
        bn2_var=jnp.ones((C,), jnp.float32),
    )

    out = jax.block_until_ready(basic_block_forward(x, params))
    ref = jax.block_until_ready(reference_forward(x, params))

    assert out.shape == (N, C, H, W)
    # bf16 MXU operands (f32 accumulation) -> looser tolerance than a pure-f32
    # kernel; reference is the exact f32 module semantics.
    assert jnp.allclose(out, ref, atol=5e-2, rtol=5e-2), "mismatch vs reference"

    print("KERNEL_OK")
</pallas_src>

<mosaic_0001>
module attributes {stable_mosaic.version = 11 : i64} {
  func.func @basic_block_kernel(%arg0: i32, %arg1: memref<1x4x256xf32, #tpu.memory_space<vmem>>, %arg2: memref<4x36xbf16, #tpu.memory_space<vmem>>, %arg3: memref<4x1xf32, #tpu.memory_space<vmem>>, %arg4: memref<4x1xf32, #tpu.memory_space<vmem>>, %arg5: memref<4x36xbf16, #tpu.memory_space<vmem>>, %arg6: memref<4x1xf32, #tpu.memory_space<vmem>>, %arg7: memref<4x1xf32, #tpu.memory_space<vmem>>, %arg8: memref<1x4x256xf32, #tpu.memory_space<vmem>>, %arg9: memref<4x512xf32, #tpu.memory_space<vmem>>) attributes {dimension_semantics = [#tpu.dimension_semantics<parallel>], iteration_bounds = array<i64: 2>, scalar_prefetch = 0 : i64, scratch_operands = 1 : i64, tpu.core_type = #tpu.core_type<tc>, window_params = [{transform_indices = @transform_0, window_bounds = array<i64: 1, 4, 256>}, {pipeline_mode = #tpu.pipeline_mode<synchronous>, transform_indices = @transform_1, window_bounds = array<i64: 4, 36>}, {pipeline_mode = #tpu.pipeline_mode<synchronous>, transform_indices = @transform_2, window_bounds = array<i64: 4, 1>}, {pipeline_mode = #tpu.pipeline_mode<synchronous>, transform_indices = @transform_3, window_bounds = array<i64: 4, 1>}, {pipeline_mode = #tpu.pipeline_mode<synchronous>, transform_indices = @transform_4, window_bounds = array<i64: 4, 36>}, {pipeline_mode = #tpu.pipeline_mode<synchronous>, transform_indices = @transform_5, window_bounds = array<i64: 4, 1>}, {pipeline_mode = #tpu.pipeline_mode<synchronous>, transform_indices = @transform_6, window_bounds = array<i64: 4, 1>}, {transform_indices = @transform_7, window_bounds = array<i64: 1, 4, 256>}]} {
    %c0 = arith.constant 0 : index
    %c0_0 = arith.constant 0 : index
    %c0_1 = arith.constant 0 : index
    %0 = vector.load %arg1[%c0, %c0_0, %c0_1] : memref<1x4x256xf32, #tpu.memory_space<vmem>>, vector<1x4x256xf32>
    %1 = vector.shape_cast %0 : vector<1x4x256xf32> to vector<4x256xf32>
    %2 = tpu.iota {dimensions = array<i32: 1>} : vector<4x256xi32>
    %c16_i32 = arith.constant 16 : i32
    %c0_i32 = arith.constant 0 : i32
    %3 = arith.cmpi eq, %c16_i32, %c0_i32 : i32
    %c1_i32 = arith.constant 1 : i32
    %4 = arith.select %3, %c1_i32, %c16_i32 : i32
    %5 = vector.broadcast %4 : i32 to vector<4x256xi32>
    %6 = arith.remsi %2, %5 : vector<4x256xi32>
    %c0_i32_2 = arith.constant 0 : i32
    %7 = vector.broadcast %c0_i32_2 : i32 to vector<4x256xi32>
    %8 = arith.cmpi ne, %6, %7 : vector<4x256xi32>
    %c0_i32_3 = arith.constant 0 : i32
    %9 = vector.broadcast %c0_i32_3 : i32 to vector<4x256xi32>
    %10 = arith.cmpi slt, %6, %9 : vector<4x256xi32>
    %c0_i32_4 = arith.constant 0 : i32
    %11 = arith.cmpi slt, %4, %c0_i32_4 : i32
    %12 = vector.broadcast %11 : i1 to vector<4x256xi1>
    %13 = vector.broadcast %12 : vector<4x256xi1> to vector<4x256xi1>
    %14 = arith.xori %10, %13 : vector<4x256xi1>
    %15 = arith.andi %14, %8 : vector<4x256xi1>
    %16 = vector.broadcast %4 : i32 to vector<4x256xi32>
    %17 = arith.addi %6, %16 : vector<4x256xi32>
    %18 = arith.select %15, %17, %6 : vector<4x256xi1>, vector<4x256xi32>
    %c1_i32_5 = arith.constant 1 : i32
    %19 = vector.broadcast %c1_i32_5 : i32 to vector<4x256xi32>
    %20 = arith.cmpi sge, %18, %19 : vector<4x256xi32>
    %c15_i32 = arith.constant 15 : i32
    %21 = vector.broadcast %c15_i32 : i32 to vector<4x256xi32>
    %22 = arith.cmpi slt, %18, %21 : vector<4x256xi32>
    %cst = arith.constant 0.000000e+00 : f32
    %23 = vector.broadcast %cst : f32 to vector<4x128xf32>
    %c0_6 = arith.constant 0 : index
    %c0_7 = arith.constant 0 : index
    %24 = vector.load %arg9[%c0_6, %c0_7] : memref<4x512xf32, #tpu.memory_space<vmem>>, vector<4x128xf32>
    tpu.vector_store %arg9[%c0_6, %c0_7], %23 {strides = array<i32>} : memref<4x512xf32, #tpu.memory_space<vmem>>, vector<4x128xf32>,
    %cst_8 = arith.constant 0.000000e+00 : f32
    %25 = vector.broadcast %cst_8 : f32 to vector<4x128xf32>
    %c0_9 = arith.constant 0 : index
    %c384 = arith.constant 384 : index
    %26 = vector.load %arg9[%c0_9, %c384] : memref<4x512xf32, #tpu.memory_space<vmem>>, vector<4x128xf32>
    tpu.vector_store %arg9[%c0_9, %c384], %25 {strides = array<i32>} : memref<4x512xf32, #tpu.memory_space<vmem>>, vector<4x128xf32>,
    %c0_10 = arith.constant 0 : index
    %c128 = arith.constant 128 : index
    %27 = vector.load %arg9[%c0_10, %c128] : memref<4x512xf32, #tpu.memory_space<vmem>>, vector<4x256xf32>
    tpu.vector_store %arg9[%c0_10, %c128], %1 {strides = array<i32>} : memref<4x512xf32, #tpu.memory_space<vmem>>, vector<4x256xf32>,
    %c0_11 = arith.constant 0 : index
    %c111 = arith.constant 111 : index
    %28 = vector.load %arg9[%c0_11, %c111] : memref<4x512xf32, #tpu.memory_space<vmem>>, vector<4x256xf32>
    %cst_12 = arith.constant 0.000000e+00 : f32
    %29 = vector.broadcast %cst_12 : f32 to vector<4x256xf32>
    %30 = arith.select %20, %28, %29 : vector<4x256xi1>, vector<4x256xf32>
    %c0_13 = arith.constant 0 : index
    %c112 = arith.constant 112 : index
    %31 = vector.load %arg9[%c0_13, %c112] : memref<4x512xf32, #tpu.memory_space<vmem>>, vector<4x256xf32>
    %c0_14 = arith.constant 0 : index
    %c113 = arith.constant 113 : index
    %32 = vector.load %arg9[%c0_14, %c113] : memref<4x512xf32, #tpu.memory_space<vmem>>, vector<4x256xf32>
    %cst_15 = arith.constant 0.000000e+00 : f32
    %33 = vector.broadcast %cst_15 : f32 to vector<4x256xf32>
    %34 = arith.select %22, %32, %33 : vector<4x256xi1>, vector<4x256xf32>
    %c0_16 = arith.constant 0 : index
    %c127 = arith.constant 127 : index
    %35 = vector.load %arg9[%c0_16, %c127] : memref<4x512xf32, #tpu.memory_space<vmem>>, vector<4x256xf32>
    %cst_17 = arith.constant 0.000000e+00 : f32
    %36 = vector.broadcast %cst_17 : f32 to vector<4x256xf32>
    %37 = arith.select %20, %35, %36 : vector<4x256xi1>, vector<4x256xf32>
    %c0_18 = arith.constant 0 : index
    %c128_19 = arith.constant 128 : index
    %38 = vector.load %arg9[%c0_18, %c128_19] : memref<4x512xf32, #tpu.memory_space<vmem>>, vector<4x256xf32>
    %c0_20 = arith.constant 0 : index
    %c129 = arith.constant 129 : index
    %39 = vector.load %arg9[%c0_20, %c129] : memref<4x512xf32, #tpu.memory_space<vmem>>, vector<4x256xf32>
    %cst_21 = arith.constant 0.000000e+00 : f32
    %40 = vector.broadcast %cst_21 : f32 to vector<4x256xf32>
    %41 = arith.select %22, %39, %40 : vector<4x256xi1>, vector<4x256xf32>
    %c0_22 = arith.constant 0 : index
    %c143 = arith.constant 143 : index
    %42 = vector.load %arg9[%c0_22, %c143] : memref<4x512xf32, #tpu.memory_space<vmem>>, vector<4x256xf32>
    %cst_23 = arith.constant 0.000000e+00 : f32
    %43 = vector.broadcast %cst_23 : f32 to vector<4x256xf32>
    %44 = arith.select %20, %42, %43 : vector<4x256xi1>, vector<4x256xf32>
    %c0_24 = arith.constant 0 : index
    %c144 = arith.constant 144 : index
    %45 = vector.load %arg9[%c0_24, %c144] : memref<4x512xf32, #tpu.memory_space<vmem>>, vector<4x256xf32>
    %c0_25 = arith.constant 0 : index
    %c145 = arith.constant 145 : index
    %46 = vector.load %arg9[%c0_25, %c145] : memref<4x512xf32, #tpu.memory_space<vmem>>, vector<4x256xf32>
    %cst_26 = arith.constant 0.000000e+00 : f32
    %47 = vector.broadcast %cst_26 : f32 to vector<4x256xf32>
    %48 = arith.select %22, %46, %47 : vector<4x256xi1>, vector<4x256xf32>
    %49 = tpu.concatenate %30, %31, %34, %37, %38, %41, %44, %45, %48 in 0 : vector<4x256xf32>, vector<4x256xf32>, vector<4x256xf32>, vector<4x256xf32>, vector<4x256xf32>, vector<4x256xf32>, vector<4x256xf32>, vector<4x256xf32>, vector<4x256xf32> -> vector<36x256xf32>
    %50 = arith.truncf %49 : vector<36x256xf32> to vector<36x256xbf16>
    %c0_27 = arith.constant 0 : index
    %c0_28 = arith.constant 0 : index
    %51 = vector.load %arg2[%c0_27, %c0_28] : memref<4x36xbf16, #tpu.memory_space<vmem>>, vector<4x36xbf16>
    %cst_29 = arith.constant dense<0.000000e+00> : vector<4x256xf32>
    %52 = tpu.matmul %51, %50, %cst_29 {dimension_numbers = #tpu.dot_dimension_numbers<[1], [0], [0], [1], [0, 0, 1, 1], [], []>} : vector<4x36xbf16>, vector<36x256xbf16>, vector<4x256xf32> -> vector<4x256xf32>
    %c0_30 = arith.constant 0 : index
    %c0_31 = arith.constant 0 : index
    %53 = vector.load %arg3[%c0_30, %c0_31] : memref<4x1xf32, #tpu.memory_space<vmem>>, vector<4x1xf32>
    %54 = vector.broadcast %53 : vector<4x1xf32> to vector<4x256xf32>
    %55 = arith.mulf %52, %54 : vector<4x256xf32>
    %c0_32 = arith.constant 0 : index
    %c0_33 = arith.constant 0 : index
    %56 = vector.load %arg4[%c0_32, %c0_33] : memref<4x1xf32, #tpu.memory_space<vmem>>, vector<4x1xf32>
    %57 = vector.broadcast %56 : vector<4x1xf32> to vector<4x256xf32>
    %58 = arith.addf %55, %57 : vector<4x256xf32>
    %cst_34 = arith.constant 0.000000e+00 : f32
    %59 = vector.broadcast %cst_34 : f32 to vector<4x256xf32>
    %60 = arith.maximumf %58, %59 : vector<4x256xf32>
    %cst_35 = arith.constant 0.000000e+00 : f32
    %61 = vector.broadcast %cst_35 : f32 to vector<4x128xf32>
    %c0_36 = arith.constant 0 : index
    %c0_37 = arith.constant 0 : index
    %62 = vector.load %arg9[%c0_36, %c0_37] : memref<4x512xf32, #tpu.memory_space<vmem>>, vector<4x128xf32>
    tpu.vector_store %arg9[%c0_36, %c0_37], %61 {strides = array<i32>} : memref<4x512xf32, #tpu.memory_space<vmem>>, vector<4x128xf32>,
    %cst_38 = arith.constant 0.000000e+00 : f32
    %63 = vector.broadcast %cst_38 : f32 to vector<4x128xf32>
    %c0_39 = arith.constant 0 : index
    %c384_40 = arith.constant 384 : index
    %64 = vector.load %arg9[%c0_39, %c384_40] : memref<4x512xf32, #tpu.memory_space<vmem>>, vector<4x128xf32>
    tpu.vector_store %arg9[%c0_39, %c384_40], %63 {strides = array<i32>} : memref<4x512xf32, #tpu.memory_space<vmem>>, vector<4x128xf32>,
    %c0_41 = arith.constant 0 : index
    %c128_42 = arith.constant 128 : index
    %65 = vector.load %arg9[%c0_41, %c128_42] : memref<4x512xf32, #tpu.memory_space<vmem>>, vector<4x256xf32>
    tpu.vector_store %arg9[%c0_41, %c128_42], %60 {strides = array<i32>} : memref<4x512xf32, #tpu.memory_space<vmem>>, vector<4x256xf32>,
    %c0_43 = arith.constant 0 : index
    %c111_44 = arith.constant 111 : index
    %66 = vector.load %arg9[%c0_43, %c111_44] : memref<4x512xf32, #tpu.memory_space<vmem>>, vector<4x256xf32>
    %cst_45 = arith.constant 0.000000e+00 : f32
    %67 = vector.broadcast %cst_45 : f32 to vector<4x256xf32>
    %68 = arith.select %20, %66, %67 : vector<4x256xi1>, vector<4x256xf32>
    %c0_46 = arith.constant 0 : index
    %c112_47 = arith.constant 112 : index
    %69 = vector.load %arg9[%c0_46, %c112_47] : memref<4x512xf32, #tpu.memory_space<vmem>>, vector<4x256xf32>
    %c0_48 = arith.constant 0 : index
    %c113_49 = arith.constant 113 : index
    %70 = vector.load %arg9[%c0_48, %c113_49] : memref<4x512xf32, #tpu.memory_space<vmem>>, vector<4x256xf32>
    %cst_50 = arith.constant 0.000000e+00 : f32
    %71 = vector.broadcast %cst_50 : f32 to vector<4x256xf32>
    %72 = arith.select %22, %70, %71 : vector<4x256xi1>, vector<4x256xf32>
    %c0_51 = arith.constant 0 : index
    %c127_52 = arith.constant 127 : index
    %73 = vector.load %arg9[%c0_51, %c127_52] : memref<4x512xf32, #tpu.memory_space<vmem>>, vector<4x256xf32>
    %cst_53 = arith.constant 0.000000e+00 : f32
    %74 = vector.broadcast %cst_53 : f32 to vector<4x256xf32>
    %75 = arith.select %20, %73, %74 : vector<4x256xi1>, vector<4x256xf32>
    %c0_54 = arith.constant 0 : index
    %c128_55 = arith.constant 128 : index
    %76 = vector.load %arg9[%c0_54, %c128_55] : memref<4x512xf32, #tpu.memory_space<vmem>>, vector<4x256xf32>
    %c0_56 = arith.constant 0 : index
    %c129_57 = arith.constant 129 : index
    %77 = vector.load %arg9[%c0_56, %c129_57] : memref<4x512xf32, #tpu.memory_space<vmem>>, vector<4x256xf32>
    %cst_58 = arith.constant 0.000000e+00 : f32
    %78 = vector.broadcast %cst_58 : f32 to vector<4x256xf32>
    %79 = arith.select %22, %77, %78 : vector<4x256xi1>, vector<4x256xf32>
    %c0_59 = arith.constant 0 : index
    %c143_60 = arith.constant 143 : index
    %80 = vector.load %arg9[%c0_59, %c143_60] : memref<4x512xf32, #tpu.memory_space<vmem>>, vector<4x256xf32>
    %cst_61 = arith.constant 0.000000e+00 : f32
    %81 = vector.broadcast %cst_61 : f32 to vector<4x256xf32>
    %82 = arith.select %20, %80, %81 : vector<4x256xi1>, vector<4x256xf32>
    %c0_62 = arith.constant 0 : index
    %c144_63 = arith.constant 144 : index
    %83 = vector.load %arg9[%c0_62, %c144_63] : memref<4x512xf32, #tpu.memory_space<vmem>>, vector<4x256xf32>
    %c0_64 = arith.constant 0 : index
    %c145_65 = arith.constant 145 : index
    %84 = vector.load %arg9[%c0_64, %c145_65] : memref<4x512xf32, #tpu.memory_space<vmem>>, vector<4x256xf32>
    %cst_66 = arith.constant 0.000000e+00 : f32
    %85 = vector.broadcast %cst_66 : f32 to vector<4x256xf32>
    %86 = arith.select %22, %84, %85 : vector<4x256xi1>, vector<4x256xf32>
    %87 = tpu.concatenate %68, %69, %72, %75, %76, %79, %82, %83, %86 in 0 : vector<4x256xf32>, vector<4x256xf32>, vector<4x256xf32>, vector<4x256xf32>, vector<4x256xf32>, vector<4x256xf32>, vector<4x256xf32>, vector<4x256xf32>, vector<4x256xf32> -> vector<36x256xf32>
    %88 = arith.truncf %87 : vector<36x256xf32> to vector<36x256xbf16>
    %c0_67 = arith.constant 0 : index
    %c0_68 = arith.constant 0 : index
    %89 = vector.load %arg5[%c0_67, %c0_68] : memref<4x36xbf16, #tpu.memory_space<vmem>>, vector<4x36xbf16>
    %cst_69 = arith.constant dense<0.000000e+00> : vector<4x256xf32>
    %90 = tpu.matmul %89, %88, %cst_69 {dimension_numbers = #tpu.dot_dimension_numbers<[1], [0], [0], [1], [0, 0, 1, 1], [], []>} : vector<4x36xbf16>, vector<36x256xbf16>, vector<4x256xf32> -> vector<4x256xf32>
    %c0_70 = arith.constant 0 : index
    %c0_71 = arith.constant 0 : index
    %91 = vector.load %arg6[%c0_70, %c0_71] : memref<4x1xf32, #tpu.memory_space<vmem>>, vector<4x1xf32>
    %92 = vector.broadcast %91 : vector<4x1xf32> to vector<4x256xf32>
    %93 = arith.mulf %90, %92 : vector<4x256xf32>
    %c0_72 = arith.constant 0 : index
    %c0_73 = arith.constant 0 : index
    %94 = vector.load %arg7[%c0_72, %c0_73] : memref<4x1xf32, #tpu.memory_space<vmem>>, vector<4x1xf32>
    %95 = vector.broadcast %94 : vector<4x1xf32> to vector<4x256xf32>
    %96 = arith.addf %93, %95 : vector<4x256xf32>
    %97 = arith.addf %96, %1 : vector<4x256xf32>
    %cst_74 = arith.constant 0.000000e+00 : f32
    %98 = vector.broadcast %cst_74 : f32 to vector<4x256xf32>
    %99 = arith.maximumf %97, %98 : vector<4x256xf32>
    %c0_75 = arith.constant 0 : index
    %c0_76 = arith.constant 0 : index
    %c0_77 = arith.constant 0 : index
    %100 = vector.load %arg8[%c0_75, %c0_76, %c0_77] : memref<1x4x256xf32, #tpu.memory_space<vmem>>, vector<1x4x256xf32>
    %101 = vector.shape_cast %100 : vector<1x4x256xf32> to vector<4x256xf32>
    %102 = vector.shape_cast %99 : vector<4x256xf32> to vector<1x4x256xf32>
    tpu.vector_store %arg8[%c0_75, %c0_76, %c0_77], %102 {strides = array<i32>} : memref<1x4x256xf32, #tpu.memory_space<vmem>>, vector<1x4x256xf32>,
    return
  }
  func.func @transform_0(%arg0: i32) -> (i32, i32, i32) {
    %c0_i32 = arith.constant 0 : i32
    %c0_i32_0 = arith.constant 0 : i32
    %c0_i32_1 = arith.constant 0 : i32
    return %arg0, %c0_i32, %c0_i32_0 : i32, i32, i32
  }
  func.func @transform_1(%arg0: i32) -> (i32, i32) {
    %c0_i32 = arith.constant 0 : i32
    %c0_i32_0 = arith.constant 0 : i32
    %c0_i32_1 = arith.constant 0 : i32
    return %c0_i32, %c0_i32_0 : i32, i32
  }
  func.func @transform_2(%arg0: i32) -> (i32, i32) {
    %c0_i32 = arith.constant 0 : i32
    %c0_i32_0 = arith.constant 0 : i32
    %c0_i32_1 = arith.constant 0 : i32
    return %c0_i32, %c0_i32_0 : i32, i32
  }
  func.func @transform_3(%arg0: i32) -> (i32, i32) {
    %c0_i32 = arith.constant 0 : i32
    %c0_i32_0 = arith.constant 0 : i32
    %c0_i32_1 = arith.constant 0 : i32
    return %c0_i32, %c0_i32_0 : i32, i32
  }
  func.func @transform_4(%arg0: i32) -> (i32, i32) {
    %c0_i32 = arith.constant 0 : i32
    %c0_i32_0 = arith.constant 0 : i32
    %c0_i32_1 = arith.constant 0 : i32
    return %c0_i32, %c0_i32_0 : i32, i32
  }
  func.func @transform_5(%arg0: i32) -> (i32, i32) {
    %c0_i32 = arith.constant 0 : i32
    %c0_i32_0 = arith.constant 0 : i32
    %c0_i32_1 = arith.constant 0 : i32
    return %c0_i32, %c0_i32_0 : i32, i32
  }
  func.func @transform_6(%arg0: i32) -> (i32, i32) {
    %c0_i32 = arith.constant 0 : i32
    %c0_i32_0 = arith.constant 0 : i32
    %c0_i32_1 = arith.constant 0 : i32
    return %c0_i32, %c0_i32_0 : i32, i32
  }
  func.func @transform_7(%arg0: i32) -> (i32, i32, i32) {
    %c0_i32 = arith.constant 0 : i32
    %c0_i32_0 = arith.constant 0 : i32
    %c0_i32_1 = arith.constant 0 : i32
    return %arg0, %c0_i32, %c0_i32_0 : i32, i32, i32
  }
}

</mosaic_0001>

<bundles_post_ra>
// kernel: basic_block_forward.1
= control target key start
LH: loop header
LB: loop body
LE: loop exit
PB: predicated region body
PF: predicated region fallthrough
CT: control target
= control target key end

     0   :  { %s992_s24 = smov 0   ;;  %s1216_s0 = inlined_call_operand.vmem [shape: f32[2,4,256], index: 0, kind: input, shape index: {}]   ;;  %s1217_s1 = inlined_call_operand.vmem [shape: bf16[4,36], index: 1, kind: input, shape index: {}]   ;;  %s1218_s2 = inlined_call_operand.vmem [shape: f32[4,1], index: 2, kind: input, shape index: {}]   ;;  %s1219_s3 = inlined_call_operand.vmem [shape: f32[4,1], index: 3, kind: input, shape index: {}]   ;;  %s1220_s4 = inlined_call_operand.vmem [shape: bf16[4,36], index: 4, kind: input, shape index: {}]   ;;  %s1221_s5 = inlined_call_operand.vmem [shape: f32[4,1], index: 5, kind: input, shape index: {}]   ;;  %s1222_s6 = inlined_call_operand.vmem [shape: f32[4,1], index: 6, kind: input, shape index: {}]   ;;  %s1223_s7 = inlined_call_operand.vmem [shape: f32[2,4,256], index: 7, kind: output, shape index: {}]  }
   0x1 LB: > { %s808_s25 = sadd.s32 4294967295, %s940_s24   ;;  %p812_p0 = scmp.ge.s32.totalorder %s940_s24, 1  ;;  %s940_s24 = sphi %s992_s24, %s17_s24  }
   0x2   : > { %p237_p1 = scmp.lt.s32.totalorder %s940_s24, 3 }
   0x4   : > { %p238_p2 = pnand %p812_p0, %p237_p1 }
   0x5   : > { %p269_p3 = scmp.lt.s32.totalorder (!%p238_p2), %s808_s25, 1  ;;  %v942_v0 = vmov (!%p238_p2), 0.0   ;;  %s943_s30 = smov (!%p238_p2), 15   ;;  %v949_v15 = vmov (!%p238_p2), 0   ;;  %v513_v17 = vld [vmem:[%s1218_s2] sm:$0xf] (!%p238_p2)  ;;  %v281_v19 = vlaneseq (!%p238_p2) }
   0x6   : > { %241 = sbr.rel (%p238_p2) target bundleno = 784 (0x310), region = 48  ;;  %312 = vst [vmem:[#allocation2] sm:$0xf] (!%p238_p2), %v942_v0  ;;  %313 = vst [vmem:[#allocation2 + $0xc] sm:$0xf] (!%p238_p2), %v942_v0  ;;  %s944_s8 = smov (!%p238_p2), 1   ;;  %504 = vmatprep.mubr.bf16.mxu0 (!%p238_p2), %v949_v15  ;;  %883 = vset.pattern.permute.xlu0 (!%p238_p2), %v949_v15 }
   0x7   : > { %s945_s9 = smov (!%p238_p2), 127   ;;  %s946_s10 = smov (!%p238_p2), 17   ;;  %884 = vset.pattern.permute.xlu1 (!%p238_p2), %v949_v15  ;;  %716 = vmatprep.mubr.bf16.mxu1 (!%p238_p2), %v949_v15  ;;  %v521_v18 = vld [vmem:[%s1219_s3] sm:$0xf] (!%p238_p2)  ;;  %v282_v20 = vand.u32 (!%p238_p2), 127, %v281_v19  ;;  %vm352_vm0 = vcmask (!%p238_p2), 7168  }
   0x8   : > { %s947_s11 = smov (!%p238_p2), 16   ;;  %s948_s12 = smov (!%p238_p2), 113   ;;  %vm326_vm2 = vcmask (!%p238_p2), 138240   ;;  %vm412_vm6 = vcmask (!%p238_p2), 130048   ;;  %vm339_vm7 = vcmask (!%p238_p2), 121856   ;;  %vm445_vm8 = vcmask (!%p238_p2), 1043456  }
   0x9   : > { %s950_s13 = smov (!%p238_p2), 112   ;;  %s951_s14 = smov (!%p238_p2), 111   ;;  %v283_v23 = vadd.s32 (!%p238_p2), 128, %v282_v20  ;;  %v288_v26 = vand.u32 (!%p238_p2), 15, %v282_v20  ;;  %vm371_vm9 = vcmask (!%p238_p2), 1039360   ;;  %vm384_vm10 = vcmask (!%p238_p2), 924672  }
   0xa   : > { %vm440_vm11 = vcmask (!%p238_p2), 916480   ;;  %vm397_vm12 = vcmask (!%p238_p2), 908288   ;;  %vm465_vm13 = vcmask (!%p238_p2), 1041408   ;;  %vm461_vm14 = vcmask (!%p238_p2), 293888  }
   0xb   : > { %v295_v27 = vand.u32 (!%p238_p2), 15, %v283_v23  ;;  %vm1049_vm3 = vcmp.ge.s32.totalorder (!%p238_p2), %v288_v26, 1  ;;  %vm1053_vm4 = vcmp.lt.s32.totalorder (!%p238_p2), %v288_v26, 15 }
   0xd   : > { %s1233_s25 = smov (!%p269_p3, %s808_s25), 1  ;;  %v361_v2 = vld [vmem:[#allocation2 + $0xc] sm:$0xf]  ;;  %vm1045_vm1 = vcmp.ge.s32.totalorder %v295_v27, 1  ;;  %vm1057_vm5 = vcmp.lt.s32.totalorder %v295_v27, 15 }
   0xe   : > { %s823_s26 = sshll.u32 %s1233_s25, 3  ;;  %532 = vst [vmem:[#allocation2 + $0xc] sm:$0xf] %v942_v0  ;;  %v433_v12 = vcombine.low %v361_v2, %v361_v2 }
   0xf   : > { %s273_s29 = scalar_lea.vmem %s1216_s0, %s823_s26 }
  0x10   : > { %v1008_v1 = vld [vmem:[%s273_s29] sm:$0xff] }
  0x11   : > { %314 = vst [vmem:[#allocation2 + $0x4] sm:$0xff] %v1008_v1  ;;  %v1020_v9 = vcombine.high %v1008_v1, %v1008_v1  ;;  %v873_v13 = vpack.i.bf16 %v433_v12, %v1008_v1  ;;  %v432_v14 = vcombine.low %v1008_v1, %v1008_v1 }
  0x13   : > { %v863_v10 = vpack.i.bf16 %v361_v2, %v1020_v9  ;;  %v878_v16 = vpack.i.bf16 %v1020_v9, %v1008_v1 }
  0x18   : > { %v315_v3 = vld [vmem:[#allocation2] sm:$0xff]  ;;  %v316_v5 = vld [vmem:[#allocation2 + $0x8] sm:$0xf] }
  0x19   : > { %333 = vrot.lane.b32.xlu1 %v315_v3, %s943_s30  ;;  %531 = vst [vmem:[#allocation2] sm:$0xf] %v942_v0  ;;  %346 = vrot.lane.b32.xlu0 %v315_v3, %s944_s8  ;;  %v319_v4 = vcombine.high %v315_v3, %v315_v3  ;;  %v405_v7 = vcombine.low %v316_v5, %v316_v5 }
  0x1a   : > { %v404_v11 = vcombine.low %v315_v3, %v315_v3 }
  0x1b   : > { %v848_v6 = vpack.i.bf16 %v316_v5, %v319_v4  ;;  %v858_v8 = vpack.i.bf16 %v405_v7, %v315_v3 }
  0x1d   : > { %365 = vrot.lane.b32.xlu1 %v1008_v1, %s945_s9  ;;  %320 = vrot.lane.b32.xlu0 %v315_v3, %s946_s10 }
  0x21   : > { %849 = vrot.lane.b32.xlu1 %v848_v6, %s946_s10  ;;  %844 = vrot.lane.b32.xlu0 %v848_v6, %s944_s8 }
  0x25   : > { %854 = vrot.lane.b32.xlu1 %v848_v6, %s943_s30  ;;  %859 = vrot.lane.b32.xlu0 %v858_v8, %s947_s11 }
  0x29   : > { %864 = vrot.lane.b32.xlu1 %v863_v10, %s945_s9  ;;  %406 = vrot.lane.b32.xlu0 %v404_v11, %s947_s11 }
  0x2d   : > { %869 = vrot.lane.b32.xlu0 %v863_v10, %s948_s12  ;;  %378 = vrot.lane.b32.xlu1 %v1008_v1, %s948_s12 }
  0x31   : > { %874 = vrot.lane.b32.xlu0 %v873_v13, %s950_s13  ;;  %434 = vrot.lane.b32.xlu1 %v432_v14, %s950_s13 }
  0x35   : > { %879 = vrot.lane.b32.xlu0 %v878_v16, %s951_s14  ;;  %395 = vrot.lane.b32.xlu1 %v361_v2, %s951_s14 }
  0x39   : > { %516 = vperm.xlu0 %883, %v513_v17   ;;  %524 = vperm.xlu1 %884, %v521_v18  }
  0x8b   : > { %v334_v21 = vpop.permute.xlu1 %333  ;;  %v347_v22 = vpop.permute.xlu0 %346 }
  0x8f   : > { %v366_v24 = vpop.permute.xlu1 %365  ;;  %v321_v25 = vpop.permute.xlu0 %320 }
  0x93   : > { %v850_v28 = vpop.permute.xlu1 %849  ;;  %v845_v29 = vpop.permute.xlu0 %844 }
  0x94   : > { %v852_v32 = vunpack.i.h.bf16 %v850_v28  ;;  %v851_v33 = vunpack.i.l.bf16 %v850_v28  ;;  %v847_v34 = vunpack.i.h.bf16 %v845_v29  ;;  %v846_v35 = vunpack.i.l.bf16 %v845_v29 }
  0x96   : > { %v353_v38 = vsel %vm352_vm0, %v347_v22, %v846_v35  ;;  %v354_v39 = vsel %vm352_vm0, %v846_v35, %v847_v34  ;;  %v328_v40 = vsel %vm326_vm2, %v851_v33, %v852_v32  ;;  %v327_v41 = vsel %vm326_vm2, %v321_v25, %v851_v33 }
  0x97   : > { %v855_v42 = vpop.permute.xlu1 %854  ;;  %v860_v43 = vpop.permute.xlu0 %859  ;;  %v332_v44 = vsel %vm1045_vm1, %v328_v40, 0.0  ;;  %v358_v45 = vsel %vm1045_vm1, %v354_v39, 0.0  ;;  %v357_v46 = vsel %vm1049_vm3, %v353_v38, 0.0  ;;  %v331_v51 = vsel %vm1049_vm3, %v327_v41, 0.0 }
  0x98   : > { %v857_v47 = vunpack.i.h.bf16 %v855_v42  ;;  %v856_v48 = vunpack.i.l.bf16 %v855_v42  ;;  %v862_v49 = vunpack.i.h.bf16 %v860_v43  ;;  %v861_v50 = vunpack.i.l.bf16 %v860_v43 }
  0x99   : > { %v420_v54 = vrot.slane %v358_v45, 4  ;;  %v419_v61 = vrot.slane %v357_v46, 4 }
  0x9a   : > { %v341_v52 = vsel %vm339_vm7, %v856_v48, %v857_v47  ;;  %v414_v53 = vsel %vm412_vm6, %v861_v50, %v862_v49  ;;  %v340_v55 = vsel %vm339_vm7, %v334_v21, %v856_v48  ;;  %v460_v49 = vld [vmem:[%s1217_s1] sm:$0x3] }
  0x9b   : > { %v865_v56 = vpop.permute.xlu1 %864  ;;  %v407_v57 = vpop.permute.xlu0 %406  ;;  %v345_v58 = vsel %vm1057_vm5, %v341_v52, 0.0  ;;  %v447_v59 = vsel %vm445_vm8, %v332_v44, %v414_v53  ;;  %v344_v60 = vsel %vm1053_vm4, %v340_v55, 0.0 }
  0x9c   : > { %v867_v62 = vunpack.i.h.bf16 %v865_v56  ;;  %v866_v63 = vunpack.i.l.bf16 %v865_v56  ;;  %v413_v0 = vsel %vm412_vm6, %v407_v57, %v861_v50  ;;  %v449_v2 = vsel %vm445_vm8, %v345_v58, %v420_v54 }
  0x9d   : > { %v455_v3 = vpack.c.bf16 %v449_v2, %v447_v59  ;;  %v446_v4 = vsel %vm445_vm8, %v331_v51, %v413_v0  ;;  %v448_v5 = vsel %vm445_vm8, %v344_v60, %v419_v61 }
  0x9e   : > { %v372_v6 = vsel %vm371_vm9, %v366_v24, %v866_v63  ;;  %v373_v7 = vsel %vm371_vm9, %v866_v63, %v867_v62  ;;  %v454_v8 = vpack.c.bf16 %v448_v5, %v446_v4 }
  0x9f   : > { %v870_v10 = vpop.permute.xlu0 %869  ;;  %472 = vmatprep.subr.bf16.mxu0 %v455_v3  ;;  %v379_v11 = vpop.permute.xlu1 %378  ;;  %v376_v12 = vsel %vm1053_vm4, %v372_v6, 0.0  ;;  %v377_v13 = vsel %vm1057_vm5, %v373_v7, 0.0 }
  0xa0   : > { %v872_v14 = vunpack.i.h.bf16 %v870_v10  ;;  %v871_v15 = vunpack.i.l.bf16 %v870_v10  ;;  %473 = vmatpush1.bf16.msra.mxu0 %v454_v8  ;;  %v428_v16 = vrot.slane %v376_v12, 4  ;;  %v429_v17 = vrot.slane %v377_v13, 4  ;;  %v581_v8 = vld [vmem:[#allocation2 + $0xc] sm:$0xf] }
  0xa2   : > { %v385_v18 = vsel %vm384_vm10, %v379_v11, %v871_v15  ;;  %v386_v21 = vsel %vm384_vm10, %v871_v15, %v872_v14  ;;  %v451_v33 = vsel %vm445_vm8, %v1020_v9, %v429_v17  ;;  %v450_v35 = vsel %vm445_vm8, %v1008_v1, %v428_v16  ;;  %v733_v15 = vld [vmem:[%s1222_s6] sm:$0xf] }
  0xa3   : > { %v875_v19 = vpop.permute.xlu0 %874  ;;  %v435_v20 = vpop.permute.xlu1 %434  ;;  %v389_v24 = vsel %vm1049_vm3, %v385_v18, 0.0  ;;  %v390_v26 = vsel %vm1045_vm1, %v386_v21, 0.0  ;;  %v649_v11 = vcombine.low %v581_v8, %v581_v8  ;;  %v725_v16 = vld [vmem:[%s1221_s5] sm:$0xf] }
  0xa4   : > { %v877_v22 = vunpack.i.h.bf16 %v875_v19  ;;  %v876_v23 = vunpack.i.l.bf16 %v875_v19 }
  0xa6   : > { %v441_v25 = vsel %vm440_vm11, %v435_v20, %v876_v23  ;;  %v442_v27 = vsel %vm440_vm11, %v876_v23, %v877_v22 }
  0xa7   : > { %v452_v28 = vsel %vm445_vm8, %v389_v24, %v441_v25  ;;  %v880_v29 = vpop.permute.xlu0 %879  ;;  %v396_v32 = vpop.permute.xlu1 %395  ;;  %v453_v34 = vsel %vm445_vm8, %v390_v26, %v442_v27 }
  0xa8   : > { %v882_v38 = vunpack.i.h.bf16 %v880_v29  ;;  %v881_v39 = vunpack.i.l.bf16 %v880_v29  ;;  %v457_v40 = vpack.c.bf16 %v453_v34, %v451_v33  ;;  %v456_v41 = vpack.c.bf16 %v452_v28, %v450_v35 }
  0xaa   : > { %v399_v42 = vsel %vm397_vm12, %v882_v38, %v396_v32  ;;  %474 = vmatprep.subr.bf16.mxu0 %v457_v40  ;;  %v398_v43 = vsel %vm397_vm12, %v881_v39, %v882_v38 }
  0xab   : > { %v403_v44 = vsel %vm1057_vm5, %v399_v42, 0.0  ;;  %475 = vmatpush1.bf16.msra.mxu0 %v456_v41  ;;  %v402_v45 = vsel %vm1053_vm4, %v398_v43, 0.0 }
  0xac   : > { %v459_v46 = vpack.c.bf16 %v403_v44, %v403_v44  ;;  %v458_v47 = vpack.c.bf16 %v402_v45, %v402_v45 }
  0xae   : > { %817 = vmatprep.subr.msk.bf16.mxu0 %vm465_vm13, %v459_v46  ;;  %v467_v48 = vsel %vm465_vm13, %v458_v47, 0 }
  0xaf   : > { %477 = vmatpush1.bf16.msra.mxu0 %v467_v48 }
  0xb2   : > { %818 = vmatmul.mubr.msk.bf16.vlgmr.msra.gmra.mrb[0].mxu0 %vm461_vm14, %v460_v49 }
  0xb8   : > { %v517_v50 = vpop.permute.xlu0 %516  ;;  %v525_v52 = vpop.permute.xlu1 %524 }
 0x185   : > { %v506_v51 = vpop.f32.mrb[0].mxu0 }
 0x186   : > { %v519_v53 = vmul.f32 %v517_v50, %v506_v51  ;;  %v508_v54 = vpop.f32.mrb[1].mxu0 }
 0x187   : > { %v520_v55 = vmul.f32 %v517_v50, %v508_v54  ;;  %v510_v56 = vpop.f32.mrb[2].mxu0 }
 0x188   : > { %v527_v57 = vadd.f32 %v525_v52, %v519_v53  ;;  %v511_v58 = vpop.f32.mrb[3].mxu0 }
 0x189   : > { %v528_v59 = vadd.f32 %v525_v52, %v520_v55 }
 0x18a   : > { %v529_v60 = vmax.f32 %v527_v57, 0.0 }
 0x18b   : > { %v530_v61 = vmax.f32 %v528_v59, 0.0 }
 0x18c   : > { %v933_v12 = vcombine.low %v529_v60, %v529_v60 }
 0x18d   : > { %v1117_v62 = vcombine.low %v529_v60, %v530_v61  ;;  %v1130_v7 = vcombine.low %v530_v61, %v530_v61 }
 0x18f   : > { %537 = vst [vmem:[#allocation2 + $0x4] sm:$0xff] %v1117_v62  ;;  %v905_v10 = vpack.i.bf16 %v581_v8, %v1130_v7  ;;  %v915_v13 = vpack.i.bf16 %v649_v11, %v1117_v62  ;;  %v920_v14 = vpack.i.bf16 %v1130_v7, %v1117_v62 }
 0x196   : > { %v538_v63 = vld [vmem:[#allocation2] sm:$0xff]  ;;  %v539_v2 = vld [vmem:[#allocation2 + $0x8] sm:$0xf] }
 0x197   : > { %543 = vrot.lane.b32.xlu1 %v538_v63, %s946_s10  ;;  %567 = vrot.lane.b32.xlu0 %v538_v63, %s944_s8  ;;  %v542_v0 = vcombine.high %v538_v63, %v538_v63  ;;  %v622_v4 = vcombine.low %v539_v2, %v539_v2  ;;  %v621_v6 = vcombine.low %v538_v63, %v538_v63 }
 0x199   : > { %v885_v3 = vpack.i.bf16 %v539_v2, %v542_v0  ;;  %v900_v5 = vpack.i.bf16 %v622_v4, %v538_v63 }
 0x19b   : > { %555 = vrot.lane.b32.xlu0 %v538_v63, %s943_s30  ;;  %886 = vrot.lane.b32.xlu1 %v885_v3, %s944_s8 }
 0x19f   : > { %585 = vrot.lane.b32.xlu0 %v1117_v62, %s945_s9  ;;  %891 = vrot.lane.b32.xlu1 %v885_v3, %s946_s10 }
 0x1a3   : > { %597 = vrot.lane.b32.xlu0 %v1117_v62, %s948_s12  ;;  %901 = vrot.lane.b32.xlu1 %v900_v5, %s947_s11 }
 0x1a7   : > { %896 = vrot.lane.b32.xlu0 %v885_v3, %s943_s30  ;;  %623 = vrot.lane.b32.xlu1 %v621_v6, %s947_s11 }
 0x1ab   : > { %906 = vrot.lane.b32.xlu0 %v905_v10, %s945_s9  ;;  %911 = vrot.lane.b32.xlu1 %v905_v10, %s948_s12  ;;  %s278_s9 = scalar_lea.vmem %s1223_s7, %s823_s26 }
 0x1af   : > { %650 = vrot.lane.b32.xlu0 %v933_v12, %s950_s13  ;;  %916 = vrot.lane.b32.xlu1 %v915_v13, %s950_s13 }
 0x1b3   : > { %613 = vrot.lane.b32.xlu0 %v581_v8, %s951_s14  ;;  %921 = vrot.lane.b32.xlu1 %v920_v14, %s951_s14 }
 0x1b7   : > { %736 = vperm.xlu0 %883, %v733_v15   ;;  %728 = vperm.xlu1 %884, %v725_v16  }
 0x209   : > { %v544_v17 = vpop.permute.xlu1 %543  ;;  %v568_v18 = vpop.permute.xlu0 %567 }
 0x20d   : > { %v556_v19 = vpop.permute.xlu0 %555  ;;  %v887_v20 = vpop.permute.xlu1 %886 }
 0x20e   : > { %v889_v21 = vunpack.i.h.bf16 %v887_v20  ;;  %v888_v22 = vunpack.i.l.bf16 %v887_v20 }
 0x210   : > { %v573_v25 = vsel %vm352_vm0, %v568_v18, %v888_v22  ;;  %v574_v26 = vsel %vm352_vm0, %v888_v22, %v889_v21 }
 0x211   : > { %v586_v23 = vpop.permute.xlu0 %585  ;;  %v892_v24 = vpop.permute.xlu1 %891  ;;  %v578_v35 = vsel %vm1045_vm1, %v574_v26, 0.0  ;;  %v577_v38 = vsel %vm1049_vm3, %v573_v25, 0.0 }
 0x212   : > { %v894_v29 = vunpack.i.h.bf16 %v892_v24  ;;  %v893_v32 = vunpack.i.l.bf16 %v892_v24  ;;  %v636_v45 = vrot.slane %v578_v35, 4  ;;  %v635_v46 = vrot.slane %v577_v38, 4 }
 0x214   : > { %v550_v43 = vsel %vm326_vm2, %v893_v32, %v894_v29  ;;  %v549_v44 = vsel %vm326_vm2, %v544_v17, %v893_v32 }
 0x215   : > { %v598_v27 = vpop.permute.xlu0 %597  ;;  %v902_v28 = vpop.permute.xlu1 %901  ;;  %v554_v53 = vsel %vm1045_vm1, %v550_v43, 0.0  ;;  %v553_v55 = vsel %vm1049_vm3, %v549_v44, 0.0 }
 0x216   : > { %v904_v33 = vunpack.i.h.bf16 %v902_v28  ;;  %v903_v34 = vunpack.i.l.bf16 %v902_v28 }
 0x218   : > { %v630_v49 = vsel %vm412_vm6, %v903_v34, %v904_v33 }
 0x219   : > { %v897_v39 = vpop.permute.xlu0 %896  ;;  %v624_v40 = vpop.permute.xlu1 %623  ;;  %v661_v61 = vsel %vm445_vm8, %v554_v53, %v630_v49 }
 0x21a   : > { %v899_v41 = vunpack.i.h.bf16 %v897_v39  ;;  %v898_v42 = vunpack.i.l.bf16 %v897_v39  ;;  %v629_v47 = vsel %vm412_vm6, %v624_v40, %v903_v34  ;;  %v674_v40 = vld [vmem:[%s1220_s4] sm:$0x3] }
 0x21b   : > { %v660_v0 = vsel %vm445_vm8, %v553_v55, %v629_v47 }
 0x21c   : > { %v562_v48 = vsel %vm339_vm7, %v898_v42, %v899_v41  ;;  %v561_v50 = vsel %vm339_vm7, %v556_v19, %v898_v42 }
 0x21d   : > { %v907_v51 = vpop.permute.xlu0 %906  ;;  %v912_v52 = vpop.permute.xlu1 %911  ;;  %v566_v54 = vsel %vm1057_vm5, %v562_v48, 0.0  ;;  %v565_v56 = vsel %vm1053_vm4, %v561_v50, 0.0 }
 0x21e   : > { %v909_v57 = vunpack.i.h.bf16 %v907_v51  ;;  %v908_v58 = vunpack.i.l.bf16 %v907_v51  ;;  %v914_v59 = vunpack.i.h.bf16 %v912_v52  ;;  %v913_v60 = vunpack.i.l.bf16 %v912_v52 }
 0x21f   : > { %v663_v63 = vsel %vm445_vm8, %v566_v54, %v636_v45  ;;  %v662_v2 = vsel %vm445_vm8, %v565_v56, %v635_v46 }
 0x220   : > { %v591_v3 = vsel %vm371_vm9, %v586_v23, %v908_v58  ;;  %v592_v4 = vsel %vm371_vm9, %v908_v58, %v909_v57  ;;  %v603_v5 = vsel %vm384_vm10, %v598_v27, %v913_v60  ;;  %v604_v6 = vsel %vm384_vm10, %v913_v60, %v914_v59 }
 0x221   : > { %v595_v8 = vsel %vm1053_vm4, %v591_v3, 0.0  ;;  %v596_v10 = vsel %vm1057_vm5, %v592_v4, 0.0  ;;  %v651_v11 = vpop.permute.xlu0 %650  ;;  %v917_v12 = vpop.permute.xlu1 %916  ;;  %v669_v13 = vpack.c.bf16 %v663_v63, %v661_v61  ;;  %v668_v14 = vpack.c.bf16 %v662_v2, %v660_v0 }
 0x222   : > { %v644_v15 = vrot.slane %v595_v8, 4  ;;  %v645_v16 = vrot.slane %v596_v10, 4  ;;  %v919_v17 = vunpack.i.h.bf16 %v917_v12  ;;  %v918_v18 = vunpack.i.l.bf16 %v917_v12 }
 0x223   : > { %684 = vmatprep.subr.bf16.mxu1 %v669_v13  ;;  %v608_v19 = vsel %vm1045_vm1, %v604_v6, 0.0  ;;  %v607_v20 = vsel %vm1049_vm3, %v603_v5, 0.0 }
 0x224   : > { %v656_v21 = vsel %vm440_vm11, %v651_v11, %v918_v18  ;;  %v657_v22 = vsel %vm440_vm11, %v918_v18, %v919_v17  ;;  %685 = vmatpush1.bf16.msra.mxu1 %v668_v14  ;;  %v665_v23 = vsel %vm445_vm8, %v1130_v7, %v645_v16  ;;  %v664_v24 = vsel %vm445_vm8, %v1117_v62, %v644_v15 }
 0x225   : > { %v922_v25 = vpop.permute.xlu1 %921  ;;  %v614_v26 = vpop.permute.xlu0 %613  ;;  %v667_v27 = vsel %vm445_vm8, %v608_v19, %v657_v22  ;;  %v666_v30 = vsel %vm445_vm8, %v607_v20, %v656_v21 }
 0x226   : > { %v924_v28 = vunpack.i.h.bf16 %v922_v25  ;;  %v923_v31 = vunpack.i.l.bf16 %v922_v25  ;;  %v671_v29 = vpack.c.bf16 %v667_v27, %v665_v23  ;;  %v670_v32 = vpack.c.bf16 %v666_v30, %v664_v24 }
 0x228   : > { %v616_v33 = vsel %vm397_vm12, %v924_v28, %v614_v26  ;;  %686 = vmatprep.subr.bf16.mxu1 %v671_v29  ;;  %v615_v34 = vsel %vm397_vm12, %v923_v31, %v924_v28 }
 0x229   : > { %v620_v7 = vsel %vm1057_vm5, %v616_v33, 0.0  ;;  %687 = vmatpush1.bf16.msra.mxu1 %v670_v32  ;;  %v619_v62 = vsel %vm1053_vm4, %v615_v34, 0.0 }
 0x22a   : > { %v673_v35 = vpack.c.bf16 %v620_v7, %v620_v7  ;;  %v672_v38 = vpack.c.bf16 %v619_v62, %v619_v62 }
 0x22c   : > { %819 = vmatprep.subr.msk.bf16.mxu1 %vm465_vm13, %v673_v35  ;;  %v679_v39 = vsel %vm465_vm13, %v672_v38, 0 }
 0x22d   : > { %689 = vmatpush1.bf16.msra.mxu1 %v679_v39 }
 0x230   : > { %820 = vmatmul.mubr.msk.bf16.vlgmr.msra.gmra.mrb[0].mxu1 %vm461_vm14, %v674_v40 }
 0x236   : > { %v729_v37 = vpop.permute.xlu1 %728  ;;  %v737_v36 = vpop.permute.xlu0 %736 }
 0x303   : > { %v718_v41 = vpop.f32.mrb[0].mxu1 }
 0x304   : > { %v731_v42 = vmul.f32 %v729_v37, %v718_v41  ;;  %v720_v43 = vpop.f32.mrb[1].mxu1 }
 0x305   : > { %v732_v44 = vmul.f32 %v729_v37, %v720_v43  ;;  %v722_v45 = vpop.f32.mrb[2].mxu1 }
 0x306   : > { %v739_v46 = vadd.f32 %v737_v36, %v731_v42  ;;  %v723_v47 = vpop.f32.mrb[3].mxu1 }
 0x307   : > { %v740_v48 = vadd.f32 %v737_v36, %v732_v44 }
 0x308   : > { %v744_v49 = vadd.f32 %v739_v46, %v1008_v1 }
 0x309   : > { %v745_v50 = vadd.f32 %v740_v48, %v1020_v9 }
 0x30a   : > { %v746_v51 = vmax.f32 %v744_v49, 0.0 }
 0x30b   : > { %v747_v52 = vmax.f32 %v745_v50, 0.0 }
 0x30d   : > { %v750_v53 = vcombine.low %v746_v51, %v747_v52 }
 0x30f   : > { %752 = vst [vmem:[%s278_s9] sm:$0xff] %v750_v53 }
 0x310 PF: > { %s17_s24 = sadd.s32 1, %s940_s24  }
 0x311   : > { %p14_p4 = scmp.ge.s32.totalorder %s17_s24, 4  }
 0x313   :  { %16 = sbr.rel (!%p14_p4) target bundleno = 1 (0x1), region = 78 }

</bundles_post_ra>
